<compile_context>
chip_gen: v5e
topology: v5e:2x2
jax: 0.10.0
libtpu: 0.0.40
codegen_flags: <defaults>
</compile_context>

<pallas_src>
import math

import jax
import jax.numpy as jnp
from jax.experimental import pallas as pl
from jax.experimental.pallas import tpu as pltpu


_LANE = 128                        # pad num_classes to a multiple of this (lane-dense stores)
_TINY_BYTES = 2 << 20              # below ~2 MiB of HBM traffic, skip the Pallas launch
_DEFAULT_VMEM_CAPACITY = 64 << 20  # conservative default (v7x physical); v5e/v6e have 128 MiB


def _round_up(x, m):
    return (x + m - 1) // m * m


def _vmem_budget_bytes():
    cap = _DEFAULT_VMEM_CAPACITY
    try:
        cap = int(pltpu.get_tpu_info().vmem_capacity_bytes)
    except Exception:
        pass
    return (3 * cap) // 4  # leave headroom for Mosaic-internal scratch


def prepare_classifier_params(weight, bias, param_dtype=None):
    """One-time parameter prep (call at init, NOT per forward call).

    weight: [num_classes, num_feature]  (PyTorch nn.Linear layout)
    bias:   [num_classes]
    Returns (w_t, b2d, num_classes):
      w_t [num_feature, C_pad] -- transposed + class-padded to a 128 multiple
                                  (MXU-native rhs layout, no in-kernel transpose)
      b2d [1, C_pad] float32
    """
    C, F = weight.shape
    C_pad = _round_up(C, _LANE)
    w = weight if param_dtype is None else weight.astype(param_dtype)
    b = bias.astype(jnp.float32)
    if C_pad != C:
        w = jnp.pad(w, ((0, C_pad - C), (0, 0)))
        b = jnp.pad(b, (0, C_pad - C))
    return jnp.transpose(w), b.reshape(1, C_pad), C


def _linear_kernel(x_ref, w_ref, b_ref, o_ref):
    # x_ref: (tm, F), w_ref: (F, C_pad), b_ref: (1, C_pad) f32 -> o_ref: (tm, C_pad)
    acc = jnp.dot(x_ref[...], w_ref[...], preferred_element_type=jnp.float32)
    o_ref[...] = (acc + b_ref[...]).astype(o_ref.dtype)


def _xla_linear(x2d, w_t, b2d, num_classes, out_dtype):
    y = jnp.dot(x2d, w_t, preferred_element_type=jnp.float32) + b2d
    return y[:, :num_classes].astype(out_dtype)


def trans_classifier_forward(x, w_t, b2d, num_classes, *, block_m=512,
                             force_pallas=False):
    """Pallas equivalent of Trans_Classifier.forward (a single nn.Linear).

    x:   [..., num_feature]
    w_t: [num_feature, C_pad]  from prepare_classifier_params
    b2d: [1, C_pad] float32    from prepare_classifier_params
    Returns [..., num_classes] in x.dtype.
    """
    orig_shape = x.shape
    F = orig_shape[-1]
    Fw, C_pad = w_t.shape
    assert Fw == F and C_pad % _LANE == 0
    C = num_classes

    x2d = x.reshape(-1, F)
    M = x2d.shape[0]

    x_item = jnp.dtype(x.dtype).itemsize
    w_item = jnp.dtype(w_t.dtype).itemsize
    out_item = x_item

    traffic = M * F * x_item + F * C_pad * w_item + M * C_pad * out_item
    if not force_pallas and traffic < _TINY_BYTES:
        # One grid step costs ~0.35 us + custom-call overhead: pure loss for
        # sub-microsecond GEMMs — let XLA fuse the linear.
        y = _xla_linear(x2d, w_t, b2d, C, x.dtype)
        return y.reshape(*orig_shape[:-1], C)

    # --- tile M; derive the per-step VMEM footprint explicitly ---------------
    sublane = {4: 8, 2: 16, 1: 32}.get(x_item, 8)
    if x_item == 2:
        block_m = max(block_m, 1024)  # bf16: bigger tiles, same byte footprint

    def footprint(tm):
        return (2 * tm * F * x_item            # x stream, double-buffered
                + 1 * F * C_pad * w_item       # weight, single-buffered (resident)
                + 1 * C_pad * 4                # bias f32, single-buffered
                + 2 * tm * C_pad * out_item)   # output, double-buffered

    budget = _vmem_budget_bytes()
    tm = block_m if M >= block_m else M        # block == full dim is always legal
    while footprint(tm) > budget and tm > sublane:
        tm = _round_up(max(tm // 2, sublane), sublane)
    if footprint(tm) > budget:
        # TODO(synk): K-tile the feature axis (reduction grid axis last, f32 VMEM
        # accumulator with pl.when init/finalize) when F*C_pad alone exceeds the
        # VMEM budget; until then fall back to the XLA linear.
        y = _xla_linear(x2d, w_t, b2d, C, x.dtype)
        return y.reshape(*orig_shape[:-1], C)

    grid_m = pl.cdiv(M, tm)  # no M padding of x: Pallas masks the boundary block

    cost = pl.CostEstimate(
        flops=2 * M * F * C_pad,
        transcendentals=0,
        bytes_accessed=int(M * F * x_item + F * C_pad * w_item
                           + M * C_pad * out_item + C_pad * 4),
    )

    out = pl.pallas_call(
        _linear_kernel,
        out_shape=jax.ShapeDtypeStruct((M, C_pad), x.dtype),
        grid_spec=pltpu.PrefetchScalarGridSpec(
            num_scalar_prefetch=0,
            grid=(grid_m,),
            in_specs=[
                pl.BlockSpec((tm, F), lambda i: (i, 0)),       # activations: streamed over M
                pl.BlockSpec((F, C_pad), lambda i: (0, 0),     # weight: grid-invariant,
                             pipeline_mode=pl.Buffered(1)),    #   single-buffered
                pl.BlockSpec((1, C_pad), lambda i: (0, 0),     # bias: grid-invariant,
                             pipeline_mode=pl.Buffered(1)),    #   single-buffered
            ],
            out_specs=pl.BlockSpec((tm, C_pad), lambda i: (i, 0)),
        ),
        compiler_params=pltpu.CompilerParams(
            dimension_semantics=("parallel",),   # megacore sharding on v7x
            vmem_limit_bytes=int(budget),        # explicit limit (v5e scoped default is 16 MiB)
        ),
        cost_estimate=cost,
    )(x2d, w_t, b2d)

    # Padded class columns hold bias-only values; slice them off (no-op when
    # num_classes is already a multiple of 128).
    out = out[:, :C]
    # TODO(synk): on v7x with small M and large C*F, add a second parallel grid
    # axis over classes so each TensorCore only DMAs half the weight.
    return out.reshape(*orig_shape[:-1], C)


def init_linear_params(key, num_feature, num_classes, dtype=jnp.float32):
    """Deterministic init mimicking nn.Linear's default (kaiming-uniform-ish)."""
    k_w, k_b = jax.random.split(key)
    bound = 1.0 / math.sqrt(num_feature)
    weight = jax.random.uniform(
        k_w, (num_classes, num_feature), dtype=dtype, minval=-bound, maxval=bound
    )
    bias = jax.random.uniform(
        k_b, (num_classes,), dtype=dtype, minval=-bound, maxval=bound
    )
    return weight, bias


if __name__ == "__main__":
    num_feature = 32
    num_classes = 16
    batch, seq = 2, 8

    key = jax.random.PRNGKey(0)
    k_x, k_p = jax.random.split(key)
    x = jax.random.normal(k_x, (batch, seq, num_feature), dtype=jnp.float32)
    weight, bias = init_linear_params(k_p, num_feature, num_classes)

    # One-time parameter prep (class padding + transpose), hoisted out of forward.
    w_t, b2d, C = prepare_classifier_params(weight, bias)

    # Exercise the Pallas kernel (auto-dispatch would route this tiny GEMM to XLA).
    y = trans_classifier_forward(x, w_t, b2d, C, force_pallas=True)
    jax.block_until_ready(y)

    y_ref = x @ weight.T + bias
    assert y.shape == (batch, seq, num_classes)
    assert jnp.allclose(y, y_ref, atol=1e-5, rtol=1e-5)

    # Auto-dispatch path (tiny problem -> plain XLA linear) matches too.
    y_auto = trans_classifier_forward(x, w_t, b2d, C)
    jax.block_until_ready(y_auto)
    assert jnp.allclose(y_auto, y_ref, atol=1e-5, rtol=1e-5)

    print("KERNEL_OK")
</pallas_src>

<mosaic_0001>
module attributes {stable_mosaic.version = 11 : i64} {
  func.func @_linear_kernel(%arg0: i32, %arg1: memref<16x32xf32, #tpu.memory_space<vmem>>, %arg2: memref<32x128xf32, #tpu.memory_space<vmem>>, %arg3: memref<1x128xf32, #tpu.memory_space<vmem>>, %arg4: memref<16x128xf32, #tpu.memory_space<vmem>>) attributes {dimension_semantics = [#tpu.dimension_semantics<parallel>], iteration_bounds = array<i64: 1>, scalar_prefetch = 0 : i64, scratch_operands = 0 : i64, tpu.core_type = #tpu.core_type<tc>, window_params = [{transform_indices = @transform_0, window_bounds = array<i64: 16, 32>}, {pipeline_mode = #tpu.pipeline_mode<synchronous>, transform_indices = @transform_1, window_bounds = array<i64: 32, 128>}, {pipeline_mode = #tpu.pipeline_mode<synchronous>, transform_indices = @transform_2, window_bounds = array<i64: 1, 128>}, {transform_indices = @transform_3, window_bounds = array<i64: 16, 128>}]} {
    %c0 = arith.constant 0 : index
    %c0_0 = arith.constant 0 : index
    %0 = vector.load %arg1[%c0, %c0_0] : memref<16x32xf32, #tpu.memory_space<vmem>>, vector<16x32xf32>
    %c0_1 = arith.constant 0 : index
    %c0_2 = arith.constant 0 : index
    %1 = vector.load %arg2[%c0_1, %c0_2] : memref<32x128xf32, #tpu.memory_space<vmem>>, vector<32x128xf32>
    %cst = arith.constant dense<0.000000e+00> : vector<16x128xf32>
    %2 = tpu.matmul %0, %1, %cst {dimension_numbers = #tpu.dot_dimension_numbers<[1], [0], [0], [1], [0, 0, 1, 1], [], []>} : vector<16x32xf32>, vector<32x128xf32>, vector<16x128xf32> -> vector<16x128xf32>
    %c0_3 = arith.constant 0 : index
    %c0_4 = arith.constant 0 : index
    %3 = vector.load %arg3[%c0_3, %c0_4] : memref<1x128xf32, #tpu.memory_space<vmem>>, vector<1x128xf32>
    %4 = vector.broadcast %3 : vector<1x128xf32> to vector<16x128xf32>
    %5 = arith.addf %2, %4 : vector<16x128xf32>
    %c0_5 = arith.constant 0 : index
    %c0_6 = arith.constant 0 : index
    %6 = vector.load %arg4[%c0_5, %c0_6] : memref<16x128xf32, #tpu.memory_space<vmem>>, vector<16x128xf32>
    tpu.vector_store %arg4[%c0_5, %c0_6], %5 {strides = array<i32>} : memref<16x128xf32, #tpu.memory_space<vmem>>, vector<16x128xf32>,
    return
  }
  func.func @transform_0(%arg0: i32) -> (i32, i32) {
    %c0_i32 = arith.constant 0 : i32
    %c0_i32_0 = arith.constant 0 : i32
    return %arg0, %c0_i32 : i32, i32
  }
  func.func @transform_1(%arg0: i32) -> (i32, i32) {
    %c0_i32 = arith.constant 0 : i32
    %c0_i32_0 = arith.constant 0 : i32
    %c0_i32_1 = arith.constant 0 : i32
    return %c0_i32, %c0_i32_0 : i32, i32
  }
  func.func @transform_2(%arg0: i32) -> (i32, i32) {
    %c0_i32 = arith.constant 0 : i32
    %c0_i32_0 = arith.constant 0 : i32
    %c0_i32_1 = arith.constant 0 : i32
    return %c0_i32, %c0_i32_0 : i32, i32
  }
  func.func @transform_3(%arg0: i32) -> (i32, i32) {
    %c0_i32 = arith.constant 0 : i32
    %c0_i32_0 = arith.constant 0 : i32
    return %arg0, %c0_i32 : i32, i32
  }
}

</mosaic_0001>

<bundles_post_ra>
// kernel: tpu_custom_call.1
= control target key start
LH: loop header
LB: loop body
LE: loop exit
PB: predicated region body
PF: predicated region fallthrough
CT: control target
= control target key end

     0   :  { %8 = vsyncpa [#allocation3], 0  ;;  %s245_s0 = inlined_call_operand.hbm [shape: f32[16,32], index: 0, kind: input, shape index: {}]   ;;  %s246_s1 = inlined_call_operand.hbm [shape: f32[32,128], index: 1, kind: input, shape index: {}]   ;;  %s247_s2 = inlined_call_operand.vmem [shape: f32[1,128], index: 2, kind: input, shape index: {}]   ;;  %s248_s3 = inlined_call_operand.hbm [shape: f32[16,128], index: 3, kind: output, shape index: {}]  }
   0x1   :  { %9 = vsyncpa [#allocation6], 0 }
   0x2   :  { %10 = vsyncpa [#allocation4], 0  ;;  %s15_s14 = sshll.u32 %s245_s0, 4  ;;  %s199_s15 = smov [#allocation2]   ;;  %s16_s14 = int_to_ptr.hbm [resolvable:$true] %s15_s14 }
   0x3   :  { %s17_s16 = sshll.u32 %s199_s15, 4  ;;  %s28_s19 = sshll.u32 %s246_s1, 4  ;;  %s18_s16 = int_to_ptr.vmem [resolvable:$true] %s17_s16  ;;  %s29_s19 = int_to_ptr.hbm [resolvable:$true] %s28_s19 }
   0x4   :  { %s200_s20 = smov 128   ;;  %s201_s21 = smov 8  }
   0x5   :  { %23 = dma.hbm_to_vmem [thread:$0]  %s16_s14, 256, %s18_s16, [#allocation3], %s200_s20, %s200_s20, %s201_s21  }
   0x6   :  { %s202_s22 = smov [#allocation5]  }
   0x7   :  { %s30_s23 = sshll.u32 %s202_s22, 4  ;;  %s31_s23 = int_to_ptr.vmem [resolvable:$true] %s30_s23 }
   0x8   :  { %36 = dma.hbm_to_vmem [thread:$0]  %s29_s19, 512, %s31_s23, [#allocation6], %s200_s20, %s200_s20, %s201_s21  }
   0x9   :  { %193 = dma.done.wait [#allocation3], 256  }
   0xa   :  { %194 = vsyncadd [#allocation3], 4294967040 }
   0xb   :  { %195 = dma.done.wait [#allocation6], 512  }
   0xc   :  { %196 = vsyncadd [#allocation6], 4294966784  ;;  %v52_v0 = vld [vmem:[#allocation5 + $0x18] sm:$0xff]  ;;  %v51_v1 = vld [vmem:[#allocation5 + $0x10] sm:$0xff]  ;;  %vm57_vm0 = vcmask 261120   ;;  %s203_s24 = smov [#allocation7]  }
   0xd   :  { %76 = vmatpush.msra.mxu0 %v52_v0  ;;  %111 = vmatpush.msra.mxu1 %v52_v0  ;;  %v50_v2 = vld [vmem:[#allocation5 + $0x8] sm:$0xff]  ;;  %v49_v3 = vld [vmem:[#allocation5] sm:$0xff]  ;;  %v47_v4 = vld [vmem:[#allocation2] sm:$0xff]  ;;  %s93_s25 = sshll.u32 %s203_s24, 4  ;;  %s95_s28 = sshll.u32 %s248_s3, 4  ;;  %s94_s25 = int_to_ptr.vmem [resolvable:$true] %s93_s25  ;;  %s96_s28 = int_to_ptr.hbm [resolvable:$true] %s95_s28 }
   0xe   :  { %v48_v5 = vld [vmem:[#allocation2 + $0x8] sm:$0xff]  ;;  %v120_v6 = vld [vmem:[%s247_s2] ss:$0 sm:$0xff] }
   0xf   :  { %77 = vmatpush.msra.mxu0 %v51_v1  ;;  %112 = vmatpush.msra.mxu1 %v51_v1 }
  0x11   :  { %78 = vmatpush.msra.mxu0 %v50_v2  ;;  %113 = vmatpush.msra.mxu1 %v50_v2 }
  0x13   :  { %79 = vmatpush.msra.mxu0 %v49_v3  ;;  %114 = vmatpush.msra.mxu1 %v49_v3 }
  0x14   :  { %109 = vmatmul.msk.f32.vlgmr.msra.gmra.mxu0 %vm57_vm0, %v47_v4  ;;  %110 = vmatmul.msk.f32.vlgmr.msra.gmra.mxu1 %vm57_vm0, %v48_v5 }
  0x91   :  { %v81_v7 = vpop.f32.mrf.mxu0  ;;  %v84_v8 = vpop.f32.mrf.mxu1 }
  0x92   :  { %v82_v9 = vadd.f32 %v120_v6, %v81_v7  ;;  %v85_v10 = vadd.f32 %v120_v6, %v84_v8 }
  0x94   :  { %87 = vst [vmem:[#allocation7] sm:$0xff] %v82_v9 }
  0x95   :  { %88 = vst [vmem:[#allocation7 + $0x8] sm:$0xff] %v85_v10 }
  0x96   :  { %101 = dma.vmem_to_hbm [thread:$0]  %s94_s25, 256, %s96_s28, [#allocation4], %s200_s20, %s200_s20, %s201_s21  }
  0x97   :  { %197 = dma.done.wait [#allocation4], 256  }
  0x98   :  { %198 = vsyncadd [#allocation4], 4294967040 }
  0x99   :  { %106 = vsyncpa [#allocation3], 1 }
  0x9a   :  { %107 = vsyncpa [#allocation6], 1 }
  0x9b   :  { %108 = vsyncpa [#allocation4], 1 }

</bundles_post_ra>
